<compile_context>
chip_gen: v7x
topology: tpu7x:2x2x1
jax: 0.10.0
libtpu: 0.0.40
codegen_flags: <defaults>
</compile_context>

<pallas_src>
import jax
import jax.numpy as jnp
from jax.experimental import pallas as pl
from jax.experimental.pallas import tpu as pltpu


def _identity_copy_kernel(x_hbm_ref, o_hbm_ref, sem):
    # DummyLayerNorm.forward(x) == x : a single whole-array HBM->HBM DMA.
    cp = pltpu.make_async_copy(x_hbm_ref, o_hbm_ref, sem)
    cp.start()
    cp.wait()


def dummy_layer_norm(x, eps=1e-5, *, skip_kernel=False):
    """Pallas implementation of DummyLayerNorm: returns x unchanged.

    x: any-shaped array (typically (batch, seq, emb_dim)).  eps is unused,
    matching the PyTorch module, which defines no parameters.

    skip_kernel=True returns x directly (the truly optimal identity: zero
    HBM traffic, zero launch overhead).  The default launches a minimal
    Pallas kernel that materializes a fresh output buffer with one DMA.
    """
    del eps  # the PyTorch module ignores eps and has no parameters

    if skip_kernel:
        # Fastest possible "identity layer norm": no kernel at all.
        return x

    return pl.pallas_call(
        _identity_copy_kernel,
        out_shape=jax.ShapeDtypeStruct(x.shape, x.dtype),
        # Keep both operands in HBM; the kernel body does the copy via DMA,
        # so there is no VMEM staging, no tiling, and no grid to pipeline.
        in_specs=[pl.BlockSpec(memory_space=pl.ANY)],
        out_specs=pl.BlockSpec(memory_space=pl.ANY),
        scratch_shapes=[pltpu.SemaphoreType.DMA],
    )(x)


if __name__ == "__main__":
    key = jax.random.PRNGKey(0)
    batch, seq, emb_dim = 2, 8, 32
    x = jax.random.normal(key, (batch, seq, emb_dim), dtype=jnp.float32)

    # Kernel path (single HBM->HBM DMA).
    y = dummy_layer_norm(x, eps=1e-5)
    y = jax.block_until_ready(y)

    assert y.shape == x.shape and y.dtype == x.dtype
    assert bool(jnp.array_equal(y, x))

    # Zero-cost path (pure pass-through), as recommended for production use.
    y_fast = dummy_layer_norm(x, eps=1e-5, skip_kernel=True)
    assert y_fast is x

    print("KERNEL_OK")
</pallas_src>

<mosaic_0001>
module attributes {stable_mosaic.version = 11 : i64} {
  func.func @_identity_copy_kernel(%arg0: memref<2x8x32xf32, #tpu.memory_space<any>>, %arg1: memref<2x8x32xf32, #tpu.memory_space<any>>, %arg2: memref<!tpu.dma_semaphore, #tpu.memory_space<semaphore_mem>>) attributes {dimension_semantics = [], scalar_prefetch = 0 : i64, scratch_operands = 1 : i64, tpu.core_type = #tpu.core_type<tc>} {
    tpu.enqueue_dma source(%arg0 : memref<2x8x32xf32, #tpu.memory_space<any>>) target(%arg1 : memref<2x8x32xf32, #tpu.memory_space<any>>) target_semaphore(%arg2 : memref<!tpu.dma_semaphore, #tpu.memory_space<semaphore_mem>>)
    tpu.wait_dma2 semaphore(%arg2 : memref<!tpu.dma_semaphore, #tpu.memory_space<semaphore_mem>>) src(%arg0 : memref<2x8x32xf32, #tpu.memory_space<any>>) dst(%arg1 : memref<2x8x32xf32, #tpu.memory_space<any>>)
    return
  }
}

</mosaic_0001>

<bundles_post_ra>
// kernel: tpu_custom_call.1
= control target key start
LH: loop header
LB: loop body
LE: loop exit
PB: predicated region body
PF: predicated region fallthrough
CT: control target
= control target key end

     0   :  { %s35_s6 = smov [#allocation2]   ;;  %s36_s7 = smov [#allocation3]   ;;  %s54_s0 = inlined_call_operand.hbm [shape: f32[2,8,32], index: 0, kind: input, shape index: {}]   ;;  %s55_s1 = inlined_call_operand.hbm [shape: f32[2,8,32], index: 1, kind: output, shape index: {}]  }
   0x1   :  { %s37_s8 = smov 0  }
   0x2   :  { %18 = dma.general %s54_s0, 256, %s55_s1, %s35_s6, %s36_s7, [#allocation4], %s37_s8, 0  }
   0x3   :  { %33 = dma.done.wait [#allocation2], 256 }
   0x4   :  { %34 = vsyncadd [#allocation2], 4294967040 }
   0x5   :  { %23 = vsyncmov [#allocation2] }
   0x8   :  { %s24_s13 = vpop.sfrf %23 }
   0x9   :  { %p29_p0 = scmp.ne.s32.totalorder %s24_s13, 0 }
   0xb   :  { %28 = shalt.err (%p29_p0)  }

</bundles_post_ra>
